<compile_context>
chip_gen: v6e
topology: v6e:2x2x1
jax: 0.10.0
libtpu: 0.0.40
codegen_flags: <defaults>
</compile_context>

<pallas_src>
import functools

import jax
import jax.numpy as jnp
from jax.experimental import pallas as pl
from jax.experimental.pallas import tpu as pltpu

EPS = 1e-5


# ---------------------------------------------------------------------------
# Kernel 1: per-(b, c) mean and unbiased variance over the spatial axis.
# ---------------------------------------------------------------------------
def _stats_kernel(x_ref, mean_ref, var_ref, *, hw):
    x = x_ref[...].astype(jnp.float32)                        # (TB, C, HW)
    m = jnp.mean(x, axis=-1, keepdims=True)                   # (TB, C, 1)
    var = jnp.sum((x - m) ** 2, axis=-1, keepdims=True) / (hw - 1)
    mean_ref[...] = m
    var_ref[...] = var


# ---------------------------------------------------------------------------
# Kernel 2: fused per-channel affine apply   out = a * x + b.
# ---------------------------------------------------------------------------
def _apply_kernel(x_ref, a_ref, b_ref, out_ref):
    x = x_ref[...].astype(jnp.float32)                        # (TB, C, HW)
    out_ref[...] = (x * a_ref[...] + b_ref[...]).astype(out_ref.dtype)


# ---------------------------------------------------------------------------
# Helpers
# ---------------------------------------------------------------------------
def _pick_batch_tile(B, C, hw, itemsize, target_bytes=2 << 20):
    """Batch several instances per grid step so each block is a few MiB."""
    per_inst = C * hw * max(int(itemsize), 4)
    tb = max(1, min(B, target_bytes // max(per_inst, 1)))
    while B % tb:
        tb -= 1
    return int(tb)


def _compiler_params(tile_bytes):
    # Explicit scoped-VMEM budget: enough for double-buffered in/out blocks plus
    # temporaries, bounded so it stays within v7x's 64 MiB physical VMEM.
    vmem = min(48 * 1024 * 1024, max(32 * 1024 * 1024, 8 * tile_bytes + (2 << 20)))
    return pltpu.CompilerParams(
        dimension_semantics=("parallel",),   # batch grid axis is independent
        vmem_limit_bytes=int(vmem),
    )


def _compute_stats(x2, tb, hw):
    B, C, _ = x2.shape
    tile_bytes = tb * C * hw * 4
    mean, var = pl.pallas_call(
        functools.partial(_stats_kernel, hw=hw),
        grid=(B // tb,),
        in_specs=[pl.BlockSpec((tb, C, hw), lambda i: (i, 0, 0))],
        out_specs=[pl.BlockSpec((tb, C, 1), lambda i: (i, 0, 0)),
                   pl.BlockSpec((tb, C, 1), lambda i: (i, 0, 0))],
        out_shape=[jax.ShapeDtypeStruct((B, C, 1), jnp.float32),
                   jax.ShapeDtypeStruct((B, C, 1), jnp.float32)],
        compiler_params=_compiler_params(tile_bytes),
    )(x2)
    return mean[..., 0], var[..., 0]                           # (B, C) each


def _apply_affine(x2, a, b, tb, hw):
    B, C, _ = x2.shape
    tile_bytes = tb * C * hw * 4
    return pl.pallas_call(
        _apply_kernel,
        grid=(B // tb,),
        in_specs=[pl.BlockSpec((tb, C, hw), lambda i: (i, 0, 0)),
                  pl.BlockSpec((tb, C, 1), lambda i: (i, 0, 0)),
                  pl.BlockSpec((tb, C, 1), lambda i: (i, 0, 0))],
        out_specs=pl.BlockSpec((tb, C, hw), lambda i: (i, 0, 0)),
        out_shape=jax.ShapeDtypeStruct((B, C, hw), x2.dtype),
        compiler_params=_compiler_params(tile_bytes),
    )(x2, a[..., None], b[..., None])


def _affine_coeffs(mean, var, params, perm, apply_crossnorm):
    """Tiny (B, C)-sized epilogue in plain JAX: CrossNorm stat swap + SelfNorm
    MLPs/softmax, collapsed into per-channel affine coefficients (a, b)."""
    fw1, fb1, fw2, fb2, gw1, gb1, gw2, gb2 = params
    std = jnp.sqrt(var + EPS)

    if apply_crossnorm:
        mean_p = mean[perm]
        std_p = std[perm]
        mean2 = mean_p                              # exact mean of CrossNorm output
        var2 = (std_p / std) ** 2 * var             # exact variance of CrossNorm output
        std2 = jnp.sqrt(var2 + EPS)
    else:
        std_p = std
        mean2, std2 = mean, std

    ms = jnp.stack([mean2, std2], axis=-1)                      # (B, C, 2)
    f = jnp.maximum(ms @ fw1 + fb1, 0.0) @ fw2 + fb2            # (B, C, 1)
    g = jnp.maximum(ms @ gw1 + gb1, 0.0) @ gw2 + gb2
    f_w = jax.nn.softmax(f[..., 0], axis=1)                     # (B, C)
    g_w = jax.nn.softmax(g[..., 0], axis=1)
    mean_w = jnp.sum(f_w * mean2, axis=1, keepdims=True)        # (B, 1)
    std_w = jnp.sum(g_w * std2, axis=1, keepdims=True)          # (B, 1)

    # out = (x' - mean2)/std2 * std_w + mean_w  with x' = (x-mean)/std*std_p + mean_p
    #     = a * x + b
    a = std_p * std_w / (std * std2)                            # (B, C)
    b = mean_w - a * mean                                       # (B, C)
    return a.astype(jnp.float32), b.astype(jnp.float32)


def cnsn_forward(x, params, perm=None, apply_crossnorm=False):
    B, C, H, W = x.shape
    hw = H * W
    x2 = x.reshape(B, C, hw)
    tb = _pick_batch_tile(B, C, hw, jnp.dtype(x.dtype).itemsize)

    mean, var = _compute_stats(x2, tb, hw)                      # (B, C) f32

    if apply_crossnorm:
        if perm is None:
            perm = jnp.arange(B)
        perm = perm.astype(jnp.int32)
    a, b = _affine_coeffs(mean, var, params, perm, apply_crossnorm)

    out = _apply_affine(x2, a, b, tb, hw)
    return out.reshape(B, C, H, W)


# ---------------------------------------------------------------------------
# Parameter init + pure-JAX reference (PyTorch semantics) for validation.
# ---------------------------------------------------------------------------
def init_params(key):
    """Deterministic init of the two (2->32->1) MLPs of SelfNorm."""
    ks = jax.random.split(key, 8)

    def lin(k, fan_in, fan_out):
        bound = 1.0 / jnp.sqrt(fan_in)
        return jax.random.uniform(k, (fan_in, fan_out), jnp.float32, -bound, bound)

    f_w1 = lin(ks[0], 2, 32)
    f_b1 = jax.random.uniform(ks[1], (1, 32), jnp.float32, -0.5, 0.5)
    f_w2 = lin(ks[2], 32, 1)
    f_b2 = jax.random.uniform(ks[3], (1, 1), jnp.float32, -0.1, 0.1)
    g_w1 = lin(ks[4], 2, 32)
    g_b1 = jax.random.uniform(ks[5], (1, 32), jnp.float32, -0.5, 0.5)
    g_w2 = lin(ks[6], 32, 1)
    g_b2 = jax.random.uniform(ks[7], (1, 1), jnp.float32, -0.1, 0.1)
    return (f_w1, f_b1, f_w2, f_b2, g_w1, g_b1, g_w2, g_b2)


def cnsn_reference(x, params, perm, apply_crossnorm):
    fw1, fb1, fw2, fb2, gw1, gb1, gw2, gb2 = params

    def stats(v):
        m = v.mean(axis=(2, 3), keepdims=True)
        var = v.var(axis=(2, 3), keepdims=True, ddof=1)
        return m, jnp.sqrt(var + EPS)

    if apply_crossnorm:
        m, s = stats(x)
        x = (x - m) / s * s[perm] + m[perm]

    m, s = stats(x)
    mean = m[:, :, 0, 0]
    std = s[:, :, 0, 0]
    ms = jnp.stack([mean, std], axis=2)                         # (B, C, 2)
    f = jnp.maximum(ms @ fw1 + fb1, 0.0) @ fw2 + fb2            # (B, C, 1)
    g = jnp.maximum(ms @ gw1 + gb1, 0.0) @ gw2 + gb2
    f_w = jax.nn.softmax(f[:, :, 0], axis=1)
    g_w = jax.nn.softmax(g[:, :, 0], axis=1)
    mean_weighted = jnp.sum(f_w * mean, axis=1)[:, None, None, None]
    std_weighted = jnp.sum(g_w * std, axis=1)[:, None, None, None]
    x_norm = (x - m) / s
    return x_norm * std_weighted + mean_weighted


if __name__ == "__main__":
    key = jax.random.PRNGKey(0)
    k_x, k_p = jax.random.split(key)

    B, C, H, W = 2, 4, 16, 16
    x = jax.random.normal(k_x, (B, C, H, W), jnp.float32) * 2.0 + 0.5
    params = init_params(k_p)
    perm = jnp.array([1, 0], dtype=jnp.int32)   # deterministic 2-instance swap

    # training-style path: CrossNorm(2-instance) applied, then SelfNorm
    out_train = cnsn_forward(x, params, perm=perm, apply_crossnorm=True)
    out_train = jax.block_until_ready(out_train)
    ref_train = cnsn_reference(x, params, perm, True)
    assert jnp.allclose(out_train, ref_train, atol=1e-3, rtol=1e-3), "train path mismatch"

    # eval path: CrossNorm is identity, only SelfNorm runs
    out_eval = cnsn_forward(x, params, apply_crossnorm=False)
    out_eval = jax.block_until_ready(out_eval)
    ref_eval = cnsn_reference(x, params, perm, False)
    assert jnp.allclose(out_eval, ref_eval, atol=1e-3, rtol=1e-3), "eval path mismatch"

    print("KERNEL_OK")
</pallas_src>

<mosaic_0001>
module attributes {stable_mosaic.version = 11 : i64} {
  func.func @_stats_kernel(%arg0: i32, %arg1: memref<2x4x256xf32, #tpu.memory_space<vmem>>, %arg2: memref<2x4x1xf32, #tpu.memory_space<vmem>>, %arg3: memref<2x4x1xf32, #tpu.memory_space<vmem>>) attributes {dimension_semantics = [#tpu.dimension_semantics<parallel>], iteration_bounds = array<i64: 1>, scalar_prefetch = 0 : i64, scratch_operands = 0 : i64, tpu.core_type = #tpu.core_type<tc>, window_params = [{transform_indices = @transform_0, window_bounds = array<i64: 2, 4, 256>}, {transform_indices = @transform_1, window_bounds = array<i64: 2, 4, 1>}, {transform_indices = @transform_2, window_bounds = array<i64: 2, 4, 1>}]} {
    %c0 = arith.constant 0 : index
    %c0_0 = arith.constant 0 : index
    %c0_1 = arith.constant 0 : index
    %0 = vector.load %arg1[%c0, %c0_0, %c0_1] : memref<2x4x256xf32, #tpu.memory_space<vmem>>, vector<2x4x256xf32>
    %cst = arith.constant dense<0.000000e+00> : vector<2x4xf32>
    %1 = vector.multi_reduction <add>, %0, %cst [2] : vector<2x4x256xf32> to vector<2x4xf32>
    %2 = vector.shape_cast %1 : vector<2x4xf32> to vector<2x4x1xf32>
    %cst_2 = arith.constant 2.560000e+02 : f32
    %3 = vector.broadcast %cst_2 : f32 to vector<2x4x1xf32>
    %4 = arith.divf %2, %3 : vector<2x4x1xf32>
    %5 = vector.broadcast %4 : vector<2x4x1xf32> to vector<2x4x256xf32>
    %6 = arith.subf %0, %5 : vector<2x4x256xf32>
    %7 = arith.mulf %6, %6 : vector<2x4x256xf32>
    %cst_3 = arith.constant dense<0.000000e+00> : vector<2x4xf32>
    %8 = vector.multi_reduction <add>, %7, %cst_3 [2] : vector<2x4x256xf32> to vector<2x4xf32>
    %9 = vector.shape_cast %8 : vector<2x4xf32> to vector<2x4x1xf32>
    %cst_4 = arith.constant 2.550000e+02 : f32
    %10 = vector.broadcast %cst_4 : f32 to vector<2x4x1xf32>
    %11 = arith.divf %9, %10 : vector<2x4x1xf32>
    %c0_5 = arith.constant 0 : index
    %c0_6 = arith.constant 0 : index
    %c0_7 = arith.constant 0 : index
    %12 = vector.load %arg2[%c0_5, %c0_6, %c0_7] : memref<2x4x1xf32, #tpu.memory_space<vmem>>, vector<2x4x1xf32>
    tpu.vector_store %arg2[%c0_5, %c0_6, %c0_7], %4 {strides = array<i32>} : memref<2x4x1xf32, #tpu.memory_space<vmem>>, vector<2x4x1xf32>,
    %c0_8 = arith.constant 0 : index
    %c0_9 = arith.constant 0 : index
    %c0_10 = arith.constant 0 : index
    %13 = vector.load %arg3[%c0_8, %c0_9, %c0_10] : memref<2x4x1xf32, #tpu.memory_space<vmem>>, vector<2x4x1xf32>
    tpu.vector_store %arg3[%c0_8, %c0_9, %c0_10], %11 {strides = array<i32>} : memref<2x4x1xf32, #tpu.memory_space<vmem>>, vector<2x4x1xf32>,
    return
  }
  func.func @transform_0(%arg0: i32) -> (i32, i32, i32) {
    %c0_i32 = arith.constant 0 : i32
    %c0_i32_0 = arith.constant 0 : i32
    %c0_i32_1 = arith.constant 0 : i32
    return %arg0, %c0_i32, %c0_i32_0 : i32, i32, i32
  }
  func.func @transform_1(%arg0: i32) -> (i32, i32, i32) {
    %c0_i32 = arith.constant 0 : i32
    %c0_i32_0 = arith.constant 0 : i32
    %c0_i32_1 = arith.constant 0 : i32
    return %arg0, %c0_i32, %c0_i32_0 : i32, i32, i32
  }
  func.func @transform_2(%arg0: i32) -> (i32, i32, i32) {
    %c0_i32 = arith.constant 0 : i32
    %c0_i32_0 = arith.constant 0 : i32
    %c0_i32_1 = arith.constant 0 : i32
    return %arg0, %c0_i32, %c0_i32_0 : i32, i32, i32
  }
}

</mosaic_0001>

<bundles_post_ra>
// kernel: tpu_custom_call.1
= control target key start
LH: loop header
LB: loop body
LE: loop exit
PB: predicated region body
PF: predicated region fallthrough
CT: control target
= control target key end

     0   :  { %8 = vsyncpa [#allocation3], 0  ;;  %s129_s9 = smov [#allocation2]   ;;  %s175_s0 = inlined_call_operand.hbm [shape: f32[2,4,256], index: 0, kind: input, shape index: {}]   ;;  %s176_s1 = inlined_call_operand.vmem [shape: f32[2,4,1], index: 1, kind: output, shape index: {0}]   ;;  %s177_s2 = inlined_call_operand.vmem [shape: f32[2,4,1], index: 2, kind: output, shape index: {1}]  }
   0x1   :  { %s14_s10 = sshll.u32 %s129_s9, 4  ;;  %s15_s10 = int_to_ptr.vmem [resolvable:$true] %s14_s10 }
   0x2   :  { %s115_s11 = scalar_lea.vmem %s15_s10, 256  ;;  %p120_p1 = scmp.lt.s32.totalorder %s15_s10, %s15_s10 }
   0x3   :  { %p116_p0 = scmp.ne.s32.totalorder %s15_s10, %s115_s11  ;;  %p121_p2 = scmp.lt.s32.totalorder %s115_s11, %s115_s11 }
   0x5   :  { %p122_p3 = por %p121_p2, %p120_p1 }
   0x7   :  { %p123_p4 = pnand %p122_p3, %p116_p0 }
   0x9   :  { %126 = shalt.err (!%p123_p4)
}
   0xa   :  { %s130_s12 = smov 128   ;;  %s131_s13 = smov 8  }
   0xb   :  { %20 = dma.hbm_to_vmem [thread:$0]  %s175_s0, 256, %s15_s10, [#allocation3], %s130_s12, %s130_s12, %s131_s13  }
   0xc   :  { %127 = dma.done.wait [#allocation3], 256  }
   0xd   :  { %128 = vsyncadd [#allocation3], 4294967040  ;;  %vm32_vm0 = vcmask 1043456   ;;  %v24_v0 = vld [vmem:[#allocation2] sm:$0xff]  ;;  %v25_v1 = vld [vmem:[#allocation2 + $0x8] sm:$0xff]  ;;  %v51_v12 = vlaneseq  ;;  %vm87_vm1 = vcmask 3072  }
   0xe   :  { %v28_v2 = vcombine.high %v24_v0, %v24_v0  ;;  %v33_v3 = vsel %vm32_vm0, %v24_v0, 0.0  ;;  %v29_v4 = vcombine.high %v25_v1, %v25_v1  ;;  %v38_v6 = vsel %vm32_vm0, %v25_v1, 0.0 }
   0xf   :  { %v132_v10 = vmov 839922192   ;;  %v52_v14 = vshrl.u32 %v51_v12, 7 }
  0x10   :  { %v34_v5 = vsel %vm32_vm0, %v28_v2, 0.0  ;;  %v39_v7 = vsel %vm32_vm0, %v29_v4, 0.0  ;;  %v49_v11 = vunpack.c.l.s4 %v132_v10 }
  0x11   :  { %v35_v8 = vadd.f32 %v34_v5, %v33_v3  ;;  %v40_v9 = vadd.f32 %v39_v7, %v38_v6 }
  0x12   :  { %v50_v13 = vunpack.c.0.s8 %v49_v11 }
  0x13   :  { %36 = vadd.xlane.f32.xlu0 %v35_v8 }
  0x14   :  { %v53_v15 = vsub.s32 %v50_v13, %v52_v14 }
  0x17   :  { %41 = vadd.xlane.f32.xlu0 %v40_v9 }
  0x9c   :  { %v37_v16 = vpop.xlane.xlu0 %36 }
  0x9d   :  { %v44_v17 = vmul.f32 0.00390625, %v37_v16 }
  0x9f   :  { %v54_v18 = vrot.slane %v44_v17, %v53_v15  ;;  %88 = vst.msk [vmem:[%s176_s1] sm:$0xf] %vm87_vm1, %v44_v17 }
  0xa0   :  { %v42_v19 = vpop.xlane.xlu0 %41 }
  0xa1   :  { %v45_v20 = vmul.f32 0.00390625, %v42_v19  ;;  %v64_v21 = vsub.f32 %v24_v0, %v54_v18 }
  0xa3   :  { %v61_v22 = vrot.slane %v45_v20, %v53_v15  ;;  %89 = vst.msk [vmem:[%s176_s1 + $0x4] sm:$0xf] %vm87_vm1, %v45_v20  ;;  %v66_v23 = vmul.f32 %v64_v21, %v64_v21 }
  0xa5   :  { %v65_v24 = vsub.f32 %v25_v1, %v61_v22  ;;  %v70_v25 = vcombine.high %v66_v23, %v66_v23  ;;  %v74_v27 = vsel %vm32_vm0, %v66_v23, 0.0 }
  0xa7   :  { %v67_v26 = vmul.f32 %v65_v24, %v65_v24  ;;  %v75_v28 = vsel %vm32_vm0, %v70_v25, 0.0 }
  0xa8   :  { %v76_v29 = vadd.f32 %v75_v28, %v74_v27 }
  0xa9   :  { %v71_v30 = vcombine.high %v67_v26, %v67_v26  ;;  %v79_v31 = vsel %vm32_vm0, %v67_v26, 0.0 }
  0xaa   :  { %77 = vadd.xlane.f32.xlu1 %v76_v29 }
  0xab   :  { %v80_v32 = vsel %vm32_vm0, %v71_v30, 0.0 }
  0xac   :  { %v81_v33 = vadd.f32 %v80_v32, %v79_v31 }
  0xae   :  { %82 = vadd.xlane.f32.xlu1 %v81_v33 }
 0x133   :  { %v78_v34 = vpop.xlane.xlu1 %77 }
 0x134   :  { %v85_v35 = vmul.f32 0.003921569, %v78_v34 }
 0x136   :  { %90 = vst.msk [vmem:[%s177_s2] sm:$0xf] %vm87_vm1, %v85_v35 }
 0x137   :  { %v83_v36 = vpop.xlane.xlu1 %82 }
 0x138   :  { %v86_v37 = vmul.f32 0.003921569, %v83_v36 }
 0x13a   :  { %91 = vst.msk [vmem:[%s177_s2 + $0x4] sm:$0xf] %vm87_vm1, %v86_v37 }
 0x13b   :  { %100 = vsyncpa [#allocation3], 1 }

</bundles_post_ra>
